<compile_context>
chip_gen: v7x
topology: tpu7x:2x2x1
jax: 0.10.0
libtpu: 0.0.40
codegen_flags: <defaults>
</compile_context>

<pallas_src>
import functools
import math

import jax
import jax.numpy as jnp
from jax.experimental import pallas as pl
from jax.experimental.pallas import tpu as pltpu


def _round_up(x, m):
    return ((x + m - 1) // m) * m


def _mf_gather_kernel(ids_ref, user_tab_ref, item_tab_ref, out_ref,
                      *, dim, k_chunk_u, k_chunk_i):
    """One batch tile: gather rows of both tables via K-chunked one-hot matmuls."""
    tile_b = ids_ref.shape[0]
    ids = ids_ref[...]                                   # (TILE_B, 3) int32
    u_ids = ids[:, 0:1]                                  # (TILE_B, 1)
    # Fused pos/neg gather: one (2*TILE_B, K) one-hot -> one MXU matmul.
    pn_ids = jnp.concatenate([ids[:, 1:2], ids[:, 2:3]], axis=0)   # (2*TILE_B, 1)

    def gather(tab_ref, ids_col, k_chunk):
        n_rows = tab_ref.shape[0]
        n_chunks = n_rows // k_chunk                     # tables padded to multiple
        m = ids_col.shape[0]

        def one_chunk(base):
            # (1, K) iota broadcast against the id column (no full-size iota).
            row_idx = jax.lax.broadcasted_iota(jnp.int32, (1, k_chunk), 1) + base
            onehot = (ids_col == row_idx).astype(tab_ref.dtype)     # (m, K)
            chunk = tab_ref[pl.ds(base, k_chunk), :]                 # (K, dim)
            return jnp.dot(onehot, chunk, preferred_element_type=jnp.float32)

        if n_chunks == 1:
            return one_chunk(0)

        def body(c, acc):
            base = pl.multiple_of(c * k_chunk, k_chunk)
            return acc + one_chunk(base)

        return jax.lax.fori_loop(0, n_chunks, body,
                                 jnp.zeros((m, dim), jnp.float32),
                                 unroll=n_chunks <= 8)

    u_emb = gather(user_tab_ref, u_ids, k_chunk_u)       # (TILE_B, dim)   f32
    pn_emb = gather(item_tab_ref, pn_ids, k_chunk_i)     # (2*TILE_B, dim) f32

    # One fused, lane-denser store: [user | pos | neg] along the lane axis.
    out_ref[...] = jnp.concatenate(
        [u_emb, pn_emb[:tile_b], pn_emb[tile_b:]], axis=-1).astype(out_ref.dtype)


def _vmem_limit_bytes():
    """Generation-aware VMEM request (per TensorCore)."""
    phys = 128 * 1024 * 1024                             # v5e / v6e physical VMEM
    try:
        phys = int(getattr(pltpu.get_tpu_info(), "vmem_capacity_bytes", phys))
    except Exception:
        pass
    # Leave headroom for compiler-internal scratch: v7x (64 MiB/core) -> 48 MiB,
    # v5e / v6e (128 MiB) -> 100 MiB.
    return max(32 << 20, min(phys - (16 << 20), 100 << 20))


def _vmem_estimate(tile_b, pu_rows, pi_rows, dim, k_chunk_u, k_chunk_i, itemsize):
    """Rough VMEM footprint, kept in sync with the actual BlockSpecs."""
    def buf(rows, cols, isz):                            # (8, 128)-padded buffer
        return _round_up(rows, 8) * _round_up(cols, 128) * isz
    tables = buf(pu_rows, dim, itemsize) + buf(pi_rows, dim, itemsize)  # Buffered(1)
    ids = 2 * buf(tile_b, 3, 4)                                         # double-buf
    outs = 2 * buf(tile_b, 3 * dim, itemsize)                           # double-buf
    onehots = buf(tile_b, k_chunk_u, itemsize) + buf(2 * tile_b, k_chunk_i, itemsize)
    accs = buf(tile_b, dim, 4) + buf(2 * tile_b, dim, 4)
    return tables + ids + outs + 2 * (onehots + accs) + (2 << 20)


@functools.partial(jax.jit, static_argnames=("tile_b", "k_chunk"))
def mf_forward(user_ids, pos_ids, neg_ids, user_table, item_table,
               *, tile_b=512, k_chunk=512):
    """Pallas equivalent of MatrixFactorization.forward."""
    B = user_ids.shape[0]
    num_users, dim = user_table.shape
    num_items, dim_i = item_table.shape
    assert dim == dim_i
    assert user_table.dtype == item_table.dtype

    # K-chunk sizes (multiple of 8 sublanes, capped at k_chunk).
    k_chunk_u = min(k_chunk, _round_up(num_users, 8))
    k_chunk_i = min(k_chunk, _round_up(num_items, 8))

    # Pad tables to a chunk multiple so in-kernel pl.ds slices never go OOB.
    # Padded rows are never selected (valid ids are < num_rows).
    def pad_rows(tab, kc):
        rows = tab.shape[0]
        pr = _round_up(rows, kc)
        return tab if pr == rows else jnp.pad(tab, ((0, pr - rows), (0, 0)))

    user_tab = pad_rows(user_table, k_chunk_u)
    item_tab = pad_rows(item_table, k_chunk_i)
    pu_rows, pi_rows = user_tab.shape[0], item_tab.shape[0]

    itemsize = jnp.dtype(user_table.dtype).itemsize
    vmem_limit = _vmem_limit_bytes()

    # Batch tile: as large as possible (multiple of 8; 128/256 multiples feed
    # the MXU M dimension fully), shrinking until the VMEM estimate fits.
    TILE_B = max(8, min(_round_up(tile_b, 8), _round_up(B, 8)))
    while TILE_B > 8 and _vmem_estimate(TILE_B, pu_rows, pi_rows, dim,
                                        k_chunk_u, k_chunk_i, itemsize) > vmem_limit:
        TILE_B = max(8, _round_up(TILE_B // 2, 8))
    assert _vmem_estimate(TILE_B, pu_rows, pi_rows, dim,
                          k_chunk_u, k_chunk_i, itemsize) <= vmem_limit, (
        "embedding tables too large for the VMEM-resident one-hot gather; "
        "see TODO(synk) for the DMA row-gather path")

    Bp = _round_up(B, TILE_B)

    # One (Bp, 3) int32 id array -> a single small input DMA per grid step.
    ids = jnp.stack([user_ids.astype(jnp.int32),
                     pos_ids.astype(jnp.int32),
                     neg_ids.astype(jnp.int32)], axis=1)
    if Bp != B:
        ids = jnp.pad(ids, ((0, Bp - B), (0, 0)))        # pad with valid id 0

    kernel = functools.partial(_mf_gather_kernel, dim=dim,
                               k_chunk_u=k_chunk_u, k_chunk_i=k_chunk_i)

    grid_spec = pltpu.PrefetchScalarGridSpec(
        num_scalar_prefetch=0,
        grid=(Bp // TILE_B,),
        in_specs=[
            pl.BlockSpec((TILE_B, 3), lambda i: (i, 0)),
            # Tables fully resident in VMEM: constant block index + single buffer.
            pl.BlockSpec((pu_rows, dim), lambda i: (0, 0),
                         pipeline_mode=pl.Buffered(1)),
            pl.BlockSpec((pi_rows, dim), lambda i: (0, 0),
                         pipeline_mode=pl.Buffered(1)),
        ],
        out_specs=pl.BlockSpec((TILE_B, 3 * dim), lambda i: (i, 0)),
    )

    out = pl.pallas_call(
        kernel,
        grid_spec=grid_spec,
        out_shape=jax.ShapeDtypeStruct((Bp, 3 * dim), user_table.dtype),
        compiler_params=pltpu.CompilerParams(
            dimension_semantics=("parallel",),   # batch tiles -> both TCs on v7x
            vmem_limit_bytes=vmem_limit,
        ),
    )(ids, user_tab, item_tab)

    # Split the fused slab and drop batch padding.
    return (out[:B, 0 * dim:1 * dim],
            out[:B, 1 * dim:2 * dim],
            out[:B, 2 * dim:3 * dim])


def xavier_uniform(key, shape, dtype=jnp.float32):
    # torch.nn.init.xavier_uniform_ on a 2D weight (num, dim):
    #   fan_in = dim, fan_out = num, bound = sqrt(6 / (fan_in + fan_out))
    fan_out, fan_in = shape
    bound = math.sqrt(6.0 / (fan_in + fan_out))
    return jax.random.uniform(key, shape, dtype=dtype, minval=-bound, maxval=bound)


if __name__ == "__main__":
    # Small, deterministic problem sizes consistent with the module.
    num_users, num_items, dim = 64, 128, 32
    batch = 20

    root = jax.random.PRNGKey(0)
    k_user, k_item, k_u, k_p, k_n = jax.random.split(root, 5)

    # Deterministic parameter init (mirrors the module's __init__).
    user_table = xavier_uniform(k_user, (num_users, dim))
    item_table = xavier_uniform(k_item, (num_items, dim))

    # forward() inputs: integer id arrays.
    user_ids = jax.random.randint(k_u, (batch,), 0, num_users, dtype=jnp.int32)
    pos_ids = jax.random.randint(k_p, (batch,), 0, num_items, dtype=jnp.int32)
    neg_ids = jax.random.randint(k_n, (batch,), 0, num_items, dtype=jnp.int32)

    u_ref = jnp.take(user_table, user_ids, axis=0)
    p_ref = jnp.take(item_table, pos_ids, axis=0)
    n_ref = jnp.take(item_table, neg_ids, axis=0)

    # Call 1: default config (single K chunk per table, batch padding 20 -> 24).
    user_emb, pos_emb, neg_emb = jax.block_until_ready(
        mf_forward(user_ids, pos_ids, neg_ids, user_table, item_table))

    # The MXU emulates f32 matmuls; for one-hot selection the table rows are
    # reconstructed to (at least) allclose tolerance vs. nn.Embedding / jnp.take.
    assert jnp.allclose(user_emb, u_ref)
    assert jnp.allclose(pos_emb, p_ref)
    assert jnp.allclose(neg_emb, n_ref)
    assert user_emb.shape == (batch, dim) and user_emb.dtype == jnp.float32
    assert pos_emb.shape == (batch, dim) and neg_emb.shape == (batch, dim)

    # Call 2: exercise the multi-step grid and the K-chunked gather path.
    user_emb2, pos_emb2, neg_emb2 = jax.block_until_ready(
        mf_forward(user_ids, pos_ids, neg_ids, user_table, item_table,
                   tile_b=8, k_chunk=64))
    assert jnp.allclose(user_emb2, u_ref)
    assert jnp.allclose(pos_emb2, p_ref)
    assert jnp.allclose(neg_emb2, n_ref)

    print("KERNEL_OK")
</pallas_src>

<mosaic_0001>
module attributes {stable_mosaic.version = 11 : i64} {
  func.func @_mf_gather_kernel(%arg0: i32, %arg1: memref<24x3xi32, #tpu.memory_space<vmem>>, %arg2: memref<64x32xf32, #tpu.memory_space<vmem>>, %arg3: memref<128x32xf32, #tpu.memory_space<vmem>>, %arg4: memref<24x96xf32, #tpu.memory_space<vmem>>) attributes {dimension_semantics = [#tpu.dimension_semantics<parallel>], iteration_bounds = array<i64: 1>, scalar_prefetch = 0 : i64, scratch_operands = 0 : i64, tpu.core_type = #tpu.core_type<tc>, window_params = [{transform_indices = @transform_0, window_bounds = array<i64: 24, 3>}, {pipeline_mode = #tpu.pipeline_mode<synchronous>, transform_indices = @transform_1, window_bounds = array<i64: 64, 32>}, {pipeline_mode = #tpu.pipeline_mode<synchronous>, transform_indices = @transform_2, window_bounds = array<i64: 128, 32>}, {transform_indices = @transform_3, window_bounds = array<i64: 24, 96>}]} {
    %c0 = arith.constant 0 : index
    %c0_0 = arith.constant 0 : index
    %0 = vector.load %arg1[%c0, %c0_0] : memref<24x3xi32, #tpu.memory_space<vmem>>, vector<24x3xi32>
    %1 = vector.extract_strided_slice %0 {offsets = [0, 0], sizes = [24, 1], strides = [1, 1]} : vector<24x3xi32> to vector<24x1xi32>
    %2 = vector.extract_strided_slice %0 {offsets = [0, 1], sizes = [24, 1], strides = [1, 1]} : vector<24x3xi32> to vector<24x1xi32>
    %3 = vector.extract_strided_slice %0 {offsets = [0, 2], sizes = [24, 1], strides = [1, 1]} : vector<24x3xi32> to vector<24x1xi32>
    %4 = tpu.concatenate %2, %3 in 0 : vector<24x1xi32>, vector<24x1xi32> -> vector<48x1xi32>
    %5 = tpu.iota {dimensions = array<i32: 1>} : vector<1x64xi32>
    %c0_i32 = arith.constant 0 : i32
    %6 = vector.broadcast %c0_i32 : i32 to vector<1x64xi32>
    %7 = arith.addi %5, %6 : vector<1x64xi32>
    %8 = vector.broadcast %1 : vector<24x1xi32> to vector<24x64xi32>
    %9 = vector.broadcast %7 : vector<1x64xi32> to vector<24x64xi32>
    %10 = arith.cmpi eq, %8, %9 : vector<24x64xi32>
    %11 = arith.extui %10 : vector<24x64xi1> to vector<24x64xi32>
    %12 = arith.sitofp %11 : vector<24x64xi32> to vector<24x64xf32>
    %c0_1 = arith.constant 0 : index
    %c0_2 = arith.constant 0 : index
    %13 = vector.load %arg2[%c0_1, %c0_2] : memref<64x32xf32, #tpu.memory_space<vmem>>, vector<64x32xf32>
    %cst = arith.constant dense<0.000000e+00> : vector<24x32xf32>
    %14 = tpu.matmul %12, %13, %cst {dimension_numbers = #tpu.dot_dimension_numbers<[1], [0], [0], [1], [0, 0, 1, 1], [], []>} : vector<24x64xf32>, vector<64x32xf32>, vector<24x32xf32> -> vector<24x32xf32>
    %15 = tpu.iota {dimensions = array<i32: 1>} : vector<1x128xi32>
    %c0_i32_3 = arith.constant 0 : i32
    %16 = vector.broadcast %c0_i32_3 : i32 to vector<1x128xi32>
    %17 = arith.addi %15, %16 : vector<1x128xi32>
    %18 = vector.broadcast %4 : vector<48x1xi32> to vector<48x128xi32>
    %19 = vector.broadcast %17 : vector<1x128xi32> to vector<48x128xi32>
    %20 = arith.cmpi eq, %18, %19 : vector<48x128xi32>
    %21 = arith.extui %20 : vector<48x128xi1> to vector<48x128xi32>
    %22 = arith.sitofp %21 : vector<48x128xi32> to vector<48x128xf32>
    %c0_4 = arith.constant 0 : index
    %c0_5 = arith.constant 0 : index
    %23 = vector.load %arg3[%c0_4, %c0_5] : memref<128x32xf32, #tpu.memory_space<vmem>>, vector<128x32xf32>
    %cst_6 = arith.constant dense<0.000000e+00> : vector<48x32xf32>
    %24 = tpu.matmul %22, %23, %cst_6 {dimension_numbers = #tpu.dot_dimension_numbers<[1], [0], [0], [1], [0, 0, 1, 1], [], []>} : vector<48x128xf32>, vector<128x32xf32>, vector<48x32xf32> -> vector<48x32xf32>
    %25 = vector.extract_strided_slice %24 {offsets = [0, 0], sizes = [24, 32], strides = [1, 1]} : vector<48x32xf32> to vector<24x32xf32>
    %26 = vector.extract_strided_slice %24 {offsets = [24, 0], sizes = [24, 32], strides = [1, 1]} : vector<48x32xf32> to vector<24x32xf32>
    %27 = tpu.concatenate %14, %25, %26 in 1 : vector<24x32xf32>, vector<24x32xf32>, vector<24x32xf32> -> vector<24x96xf32>
    %c0_7 = arith.constant 0 : index
    %c0_8 = arith.constant 0 : index
    %28 = vector.load %arg4[%c0_7, %c0_8] : memref<24x96xf32, #tpu.memory_space<vmem>>, vector<24x96xf32>
    tpu.vector_store %arg4[%c0_7, %c0_8], %27 {strides = array<i32>} : memref<24x96xf32, #tpu.memory_space<vmem>>, vector<24x96xf32>,
    return
  }
  func.func @transform_0(%arg0: i32) -> (i32, i32) {
    %c0_i32 = arith.constant 0 : i32
    %c0_i32_0 = arith.constant 0 : i32
    return %arg0, %c0_i32 : i32, i32
  }
  func.func @transform_1(%arg0: i32) -> (i32, i32) {
    %c0_i32 = arith.constant 0 : i32
    %c0_i32_0 = arith.constant 0 : i32
    %c0_i32_1 = arith.constant 0 : i32
    return %c0_i32, %c0_i32_0 : i32, i32
  }
  func.func @transform_2(%arg0: i32) -> (i32, i32) {
    %c0_i32 = arith.constant 0 : i32
    %c0_i32_0 = arith.constant 0 : i32
    %c0_i32_1 = arith.constant 0 : i32
    return %c0_i32, %c0_i32_0 : i32, i32
  }
  func.func @transform_3(%arg0: i32) -> (i32, i32) {
    %c0_i32 = arith.constant 0 : i32
    %c0_i32_0 = arith.constant 0 : i32
    return %arg0, %c0_i32 : i32, i32
  }
}

</mosaic_0001>

<bundles_post_ra>
// kernel: mf_forward.1
= control target key start
LH: loop header
LB: loop body
LE: loop exit
PB: predicated region body
PF: predicated region fallthrough
CT: control target
= control target key end

     0   :  { %8 = vsyncpa [#allocation3], 0  ;;  %s785_s0 = inlined_call_operand.hbm [shape: s32[24,3], index: 0, kind: input, shape index: {}]   ;;  %s786_s1 = inlined_call_operand.hbm [shape: f32[64,32], index: 1, kind: input, shape index: {}]   ;;  %s787_s2 = inlined_call_operand.hbm [shape: f32[128,32], index: 2, kind: input, shape index: {}]   ;;  %s788_s3 = inlined_call_operand.hbm [shape: f32[24,96], index: 3, kind: output, shape index: {}]  }
   0x1   :  { %9 = vsyncpa [#allocation6], 0 }
   0x2   :  { %10 = vsyncpa [#allocation4], 0  ;;  %s658_s12 = smov [#allocation5]   ;;  %s659_s14 = smov [#allocation2]  }
   0x3   :  { %s28_s13 = sshll.u32 %s658_s12, 4  ;;  %s16_s15 = sshll.u32 %s659_s14, 4  ;;  %s29_s13 = int_to_ptr.vmem [resolvable:$true] %s28_s13  ;;  %s693_s15 = int_to_ptr.vmem [resolvable:$true] %s16_s15 }
   0x4   :  { %s564_s18 = scalar_lea.hbm %s786_s1, 1024 }
   0x5   :  { %p565_p0 = scmp.ne.s32.totalorder %s786_s1, %s564_s18  ;;  %p568_p1 = scmp.lt.u32.totalorder %s564_s18, %s786_s1 }
   0x7   :  { %p570_p2 = pnand %p568_p1, %p565_p0 }
   0x9   :  { %573 = shalt.err (!%p570_p2)
}
   0xa   :  { %s574_s23 = scalar_lea.vmem %s29_s13, 1024  ;;  %p579_p4 = scmp.lt.s32.totalorder %s29_s13, %s29_s13 }
   0xb   :  { %p575_p3 = scmp.ne.s32.totalorder %s29_s13, %s574_s23  ;;  %p580_p5 = scmp.lt.s32.totalorder %s574_s23, %s574_s23 }
   0xd   :  { %p581_p6 = por %p580_p5, %p579_p4 }
   0xf   :  { %p582_p7 = pnand %p581_p6, %p575_p3 }
  0x11   :  { %585 = shalt.err (!%p582_p7)
}
  0x12   :  { %s660_s24 = smov 128   ;;  %s661_s25 = smov 8  }
  0x13   :  { %34 = dma.hbm_to_vmem [thread:$0]  %s786_s1, 1024, %s29_s13, [#allocation6], %s660_s24, %s660_s24, %s661_s25  }
  0x14   :  { %s586_s30 = scalar_lea.hbm %s785_s0, 384 }
  0x15   :  { %p587_p8 = scmp.ne.s32.totalorder %s785_s0, %s586_s30  ;;  %p590_p9 = scmp.lt.u32.totalorder %s586_s30, %s785_s0 }
  0x17   :  { %p592_p10 = pnand %p590_p9, %p587_p8 }
  0x19   :  { %595 = shalt.err (!%p592_p10)
}
  0x1a   :  { %s596_s8 = scalar_lea.vmem %s693_s15, 384  ;;  %p601_p12 = scmp.lt.s32.totalorder %s693_s15, %s693_s15 }
  0x1b   :  { %p597_p11 = scmp.ne.s32.totalorder %s693_s15, %s596_s8  ;;  %p602_p13 = scmp.lt.s32.totalorder %s596_s8, %s596_s8 }
  0x1d   :  { %p603_p0 = por %p602_p13, %p601_p12 }
  0x1f   :  { %p604_p1 = pnand %p603_p0, %p597_p11 }
  0x21   :  { %607 = shalt.err (!%p604_p1)
}
  0x22   :  { %22 = dma.hbm_to_vmem [thread:$0]  %s785_s0, 384, %s693_s15, [#allocation3], %s660_s24, %s660_s24, %s661_s25  }
  0x23   :  { %s662_s10 = smov [#allocation7]   ;;  %s608_s14 = scalar_lea.hbm %s787_s2, 2048 }
  0x24   :  { %s40_s11 = sshll.u32 %s662_s10, 4  ;;  %p609_p2 = scmp.ne.s32.totalorder %s787_s2, %s608_s14  ;;  %s41_s11 = int_to_ptr.vmem [resolvable:$true] %s40_s11 }
  0x25   :  { %p612_p3 = scmp.lt.u32.totalorder %s608_s14, %s787_s2 }
  0x27   :  { %p614_p4 = pnand %p612_p3, %p609_p2 }
  0x29   :  { %617 = shalt.err (!%p614_p4)
}
  0x2a   :  { %s618_s20 = scalar_lea.vmem %s41_s11, 2048  ;;  %p623_p6 = scmp.lt.s32.totalorder %s41_s11, %s41_s11 }
  0x2b   :  { %p619_p5 = scmp.ne.s32.totalorder %s41_s11, %s618_s20  ;;  %p624_p7 = scmp.lt.s32.totalorder %s618_s20, %s618_s20 }
  0x2d   :  { %p625_p8 = por %p624_p7, %p623_p6 }
  0x2f   :  { %p626_p9 = pnand %p625_p8, %p619_p5 }
  0x31   :  { %629 = shalt.err (!%p626_p9)
}
  0x32   :  { %46 = dma.hbm_to_vmem [thread:$0]  %s787_s2, 2048, %s41_s11, [#allocation6], %s660_s24, %s660_s24, %s661_s25  }
  0x33   :  { %652 = dma.done.wait [#allocation3], 384  }
  0x34   :  { %653 = vsyncadd [#allocation3], 4294966912 }
  0x35   :  { %654 = dma.done.wait [#allocation6], 3072  }
  0x36   :  { %655 = vsyncadd [#allocation6], 4294964224  ;;  %v663_v0 = vmov 1   ;;  %v747_v1 = vld [vmem:[#allocation2] sm:$0xff]  ;;  %v749_v2 = vld [vmem:[#allocation2 + $0x10] sm:$0xff]  ;;  %s664_s21 = smov 127   ;;  %v65_v38 = vlaneseq }
  0x37   :  { %559 = vset.pattern.permute.xlu1 %v663_v0  ;;  %560 = vset.pattern.permute.xlu0 %v663_v0  ;;  %v219_v3 = vld [vmem:[#allocation7] sm:$0xff]  ;;  %v220_v4 = vld [vmem:[#allocation7 + $0x8] sm:$0xff]  ;;  %v221_v5 = vld [vmem:[#allocation7 + $0x10] sm:$0xff]  ;;  %v665_v33 = vmov 0.0|0.0   ;;  %v666_v37 = vmov 0   ;;  %vm667_vm0 = vmmov 0  }
  0x38   :  { %59 = vrot.lane.b32.xlu0 %v747_v1, %s664_s21  ;;  %63 = vrot.lane.b32.xlu1 %v749_v2, %s664_s21  ;;  %v57_v6 = vld [vmem:[#allocation2 + $0x8] sm:$0xff]  ;;  %v512_v7 = vpack.c.bf16 %v220_v4, %v219_v3  ;;  %v222_v8 = vld [vmem:[#allocation7 + $0x18] sm:$0xff]  ;;  %v223_v10 = vld [vmem:[#allocation7 + $0x20] sm:$0xff]  ;;  %v668_v42 = vmov 0.0   ;;  %v66_v43 = vand.u32 127, %v65_v38  ;;  %v669_v48 = vmov 1.0  }
  0x39   :  { %v516_v9 = vpack.c.bf16 %v222_v8, %v221_v5  ;;  %v224_v11 = vld [vmem:[#allocation7 + $0x28] sm:$0xff]  ;;  %v225_v13 = vld [vmem:[#allocation7 + $0x30] sm:$0xff]  ;;  %v226_v14 = vld [vmem:[#allocation7 + $0x38] sm:$0xff]  ;;  %500 = vmatprep.subr.bf16.mxu0 %v665_v33  ;;  %450 = vmatprep.mubr.msk.f32.mxu0 %vm667_vm0, %v668_v42  ;;  %vm93_vm7 = vcmask 523264   ;;  %s670_s2 = smov 32   ;;  %s671_s22 = smov 64  }
  0x3a   :  { %513 = vmatprep.subr.bf16.mxu1 %v512_v7  ;;  %v520_v12 = vpack.c.bf16 %v224_v11, %v223_v10  ;;  %v524_v15 = vpack.c.bf16 %v226_v14, %v225_v13  ;;  %v227_v16 = vld [vmem:[#allocation7 + $0x40] sm:$0xff]  ;;  %v228_v17 = vld [vmem:[#allocation7 + $0x48] sm:$0xff]  ;;  %v229_v19 = vld [vmem:[#allocation7 + $0x50] sm:$0xff]  ;;  %vm354_vm11 = vcmask 261120   ;;  %vm361_vm12 = vcmask 785408   ;;  %s672_s23 = smov [#allocation8]  }
  0x3b   :  { %515 = vmatpush3.bf16.msra.mxu1 %v512_v7  ;;  %v528_v18 = vpack.c.bf16 %v228_v17, %v227_v16  ;;  %v230_v20 = vld [vmem:[#allocation7 + $0x58] sm:$0xff]  ;;  %v231_v22 = vld [vmem:[#allocation7 + $0x60] sm:$0xff]  ;;  %v232_v23 = vld [vmem:[#allocation7 + $0x68] sm:$0xff]  ;;  %s370_s26 = sshll.u32 %s672_s23, 4  ;;  %s371_s26 = int_to_ptr.vmem [resolvable:$true] %s370_s26 }
  0x3c   :  { %61 = vrot.lane.b32.xlu0 %v57_v6, %s664_s21  ;;  %184 = vperm.xlu1 %559, %v747_v1   ;;  %v532_v21 = vpack.c.bf16 %v230_v20, %v229_v19  ;;  %v536_v24 = vpack.c.bf16 %v232_v23, %v231_v22  ;;  %v233_v25 = vld [vmem:[#allocation7 + $0x70] sm:$0xff]  ;;  %v234_v26 = vld [vmem:[#allocation7 + $0x78] sm:$0xff]  ;;  %v85_v31 = vld [vmem:[#allocation5] sm:$0xff]  ;;  %s630_s27 = scalar_lea.vmem %s371_s26, 384  ;;  %p635_p11 = scmp.lt.s32.totalorder %s371_s26, %s371_s26 }
  0x3d   :  { %517 = vmatprep.subr.bf16.mxu1 %v516_v9  ;;  %v540_v27 = vpack.c.bf16 %v234_v26, %v233_v25  ;;  %v86_v32 = vld [vmem:[#allocation5 + $0x8] sm:$0xff]  ;;  %v87_v35 = vld [vmem:[#allocation5 + $0x10] sm:$0xff]  ;;  %v88_v36 = vld [vmem:[#allocation5 + $0x18] sm:$0xff]  ;;  %p631_p10 = scmp.ne.s32.totalorder %s371_s26, %s630_s27  ;;  %p636_p12 = scmp.lt.s32.totalorder %s630_s27, %s630_s27 }
  0x3e   :  { %v501_v34 = vpack.c.bf16 %v86_v32, %v85_v31  ;;  %v504_v39 = vpack.c.bf16 %v88_v36, %v87_v35  ;;  %v89_v40 = vld [vmem:[#allocation5 + $0x20] sm:$0xff]  ;;  %v90_v41 = vld [vmem:[#allocation5 + $0x28] sm:$0xff]  ;;  %v91_v45 = vld [vmem:[#allocation5 + $0x30] sm:$0xff] }
  0x3f   :  { %519 = vmatpush3.bf16.msra.mxu1 %v516_v9  ;;  %v507_v44 = vpack.c.bf16 %v90_v41, %v89_v40  ;;  %v92_v46 = vld [vmem:[#allocation5 + $0x38] sm:$0xff]  ;;  %p637_p13 = por %p636_p12, %p635_p11 }
  0x40   :  { %187 = vperm.xlu0 %560, %v57_v6   ;;  %190 = vperm.xlu1 %559, %v749_v2   ;;  %v510_v49 = vpack.c.bf16 %v92_v46, %v91_v45 }
  0x41   :  { %521 = vmatprep.subr.bf16.mxu1 %v520_v12  ;;  %502 = vmatpush3.bf16.msra.mxu0 %v501_v34  ;;  %p638_p0 = pnand %p637_p13, %p631_p10 }
  0x42   :  { %503 = vmatprep.subr.bf16.mxu0 %v665_v33 }
  0x43   :  { %523 = vmatpush3.bf16.msra.mxu1 %v520_v12 }
  0x44   :  { %525 = vmatprep.subr.bf16.mxu1 %v524_v15 }
  0x45   :  { %505 = vmatpush3.bf16.msra.mxu0 %v504_v39 }
  0x46   :  { %506 = vmatprep.subr.bf16.mxu0 %v665_v33 }
  0x47   :  { %527 = vmatpush3.bf16.msra.mxu1 %v524_v15 }
  0x48   :  { %529 = vmatprep.subr.bf16.mxu1 %v528_v18 }
  0x49   :  { %508 = vmatpush3.bf16.msra.mxu0 %v507_v44 }
  0x4a   :  { %509 = vmatprep.subr.bf16.mxu0 %v665_v33 }
  0x4b   :  { %531 = vmatpush3.bf16.msra.mxu1 %v528_v18 }
  0x4c   :  { %533 = vmatprep.subr.bf16.mxu1 %v532_v21 }
  0x4d   :  { %511 = vmatpush3.bf16.msra.mxu0 %v510_v49 }
  0x4f   :  { %535 = vmatpush3.bf16.msra.mxu1 %v532_v21 }
  0x50   :  { %537 = vmatprep.subr.bf16.mxu1 %v536_v24 }
  0x53   :  { %539 = vmatpush3.bf16.msra.mxu1 %v536_v24 }
  0x54   :  { %541 = vmatprep.subr.bf16.mxu1 %v540_v27 }
  0x57   :  { %543 = vmatpush3.bf16.msra.mxu1 %v540_v27 }
  0xaa   :  { %v60_v28 = vpop.permute.xlu0 %59  ;;  %v64_v29 = vpop.permute.xlu1 %63 }
  0xab   :  { %193 = vperm.xlu1 %559, %v60_v28  }
  0xae   :  { %v62_v30 = vpop.permute.xlu0 %61 }
  0xaf   :  { %199 = vperm.xlu1 %559, %v64_v29   ;;  %196 = vperm.xlu0 %560, %v62_v30  }
  0xb3   :  { %561 = vset.pattern.permute.xlu0 %v666_v37  ;;  %562 = vset.pattern.permute.xlu1 %v666_v37 }
  0xb4   :  { %68 = vperm.xlu0 %561, %v747_v1   ;;  %71 = vperm.xlu1 %562, %v57_v6  }
  0xb8   :  { %74 = vperm.xlu1 %562, %v749_v2   ;;  %563 = vset.pattern.permute.xlu0 %v663_v0 }
  0xbb   :  { %v185_v47 = vpop.permute.xlu1 %184 }
  0xbc   :  { %vm201_vm1 = vcmp.eq.s32.totalorder %v185_v47, %v66_v43 }
  0xbd   :  { %491 = vmatprep.mubr.msk.f32.mxu1 %vm201_vm1, %v669_v48 }
  0xbf   :  { %v188_v50 = vpop.permute.xlu0 %187  ;;  %v191_v51 = vpop.permute.xlu1 %190 }
  0xc0   :  { %vm202_vm2 = vcmp.eq.s32.totalorder %v188_v50, %v66_v43  ;;  %vm203_vm3 = vcmp.eq.s32.totalorder %v191_v51, %v66_v43 }
  0xc1   :  { %492 = vmatmul.mubr.msk.f32.vlgmr.msra.gmra.mrb[0].mxu1 %vm202_vm2, %v669_v48 }
  0xc2   :  { %494 = vmatprep.mubr.msk.f32.mxu1 %vm203_vm3, %v669_v48 }
 0x12a   :  { %v194_v52 = vpop.permute.xlu1 %193 }
 0x12b   :  { %vm204_vm4 = vcmp.eq.s32.totalorder %v194_v52, %v66_v43 }
 0x12c   :  { %495 = vmatmul.mubr.msk.f32.gmra.mrb[2].mxu1 %vm204_vm4, %v669_v48 }
 0x12e   :  { %v200_v53 = vpop.permute.xlu1 %199  ;;  %v197_v54 = vpop.permute.xlu0 %196 }
 0x12f   :  { %vm206_vm5 = vcmp.eq.s32.totalorder %v200_v53, %v66_v43  ;;  %vm205_vm6 = vcmp.eq.s32.totalorder %v197_v54, %v66_v43 }
 0x130   :  { %497 = vmatprep.mubr.msk.f32.mxu1 %vm205_vm6, %v669_v48 }
 0x131   :  { %498 = vmatmul.mubr.msk.f32.gmra.mrb[4].mxu1 %vm206_vm5, %v669_v48 }
 0x133   :  { %v69_v55 = vpop.permute.xlu0 %68  ;;  %v72_v56 = vpop.permute.xlu1 %71 }
 0x134   :  { %vm76_vm8 = vcmp.eq.s32.totalorder %v69_v55, %v66_v43  ;;  %vm77_vm9 = vcmp.eq.s32.totalorder %v72_v56, %v66_v43 }
 0x135   :  { %v383_v57 = vsel %vm76_vm8, 1.0, %v668_v42  ;;  %v384_v58 = vsel %vm77_vm9, 1.0, %v668_v42 }
 0x136   :  { %451 = vmatmul.mubr.msk.f32.vlgmr.msra.gmra.mrb[0].mxu0 %vm93_vm7, %v383_v57 }
 0x137   :  { %453 = vmatprep.mubr.msk.f32.mxu0 %vm667_vm0, %v668_v42  ;;  %v75_v59 = vpop.permute.xlu1 %74 }
 0x138   :  { %vm78_vm10 = vcmp.eq.s32.totalorder %v75_v59, %v66_v43 }
 0x139   :  { %v385_v60 = vsel %vm78_vm10, 1.0, %v668_v42 }
 0x13a   :  { %454 = vmatmul.mubr.msk.f32.gmra.mrb[2].mxu0 %vm93_vm7, %v384_v58 }
 0x13b   :  { %456 = vmatprep.mubr.msk.f32.mxu0 %vm667_vm0, %v668_v42 }
 0x13e   :  { %457 = vmatmul.mubr.msk.f32.gmra.mrb[4].mxu0 %vm93_vm7, %v385_v60 }
 0x194   :  { %v493_v61 = vpop.f32.mrb[0].mxu1 }
 0x195   :  { %335 = vrot.lane.b32.xlu1 %v493_v61, %s670_s2  ;;  %v301_v62 = vpop.f32.mrb[1].mxu1 }
 0x196   :  { %333 = vrot.lane.b32.xlu0 %v301_v62, %s670_s2 }
 0x1ff   :  { %v496_v63 = vpop.f32.mrb[2].mxu1 }
 0x200   :  { %345 = vrot.lane.b32.xlu1 %v496_v63, %s671_s22  ;;  %v311_v0 = vpop.f32.mrb[3].mxu1 }
 0x201   :  { %337 = vrot.lane.b32.xlu0 %v311_v0, %s670_s2 }
 0x204   :  { %v499_v1 = vpop.f32.mrb[4].mxu1 }
 0x205   :  { %349 = vrot.lane.b32.xlu1 %v499_v1, %s671_s22  ;;  %v321_v2 = vpop.f32.mrb[5].mxu1 }
 0x206   :  { %347 = vrot.lane.b32.xlu0 %v321_v2, %s671_s22 }
 0x207   :  { %v336_v9 = vpop.permute.xlu1 %335 }
 0x208   :  { %v334_v10 = vpop.permute.xlu0 %333 }
 0x209   :  { %v169_v3 = vpop.f32.mrb[0].mxu0 }
 0x20a   :  { %v452_v4 = vpop.f32.mrb[1].mxu0  ;;  %v355_v11 = vsel %vm354_vm11, %v169_v3, %v334_v10 }
 0x20d   :  { %v174_v5 = vpop.f32.mrb[2].mxu0 }
 0x20e   :  { %v455_v6 = vpop.f32.mrb[3].mxu0  ;;  %v356_v17 = vsel %vm354_vm11, %v174_v5, %v336_v9 }
 0x211   :  { %v179_v7 = vpop.f32.mrb[4].mxu0 }
 0x212   :  { %v458_v8 = vpop.f32.mrb[5].mxu0 }
 0x272   :  { %v346_v12 = vpop.permute.xlu1 %345 }
 0x273   :  { %v358_v13 = vsel %vm93_vm7, %v355_v11, %v346_v12  ;;  %v338_v14 = vpop.permute.xlu0 %337 }
 0x274   :  { %362 = vst.msk [vmem:[#allocation8] sm:$0xff] %vm361_vm12, %v358_v13  ;;  %v357_v15 = vsel %vm354_vm11, %v179_v7, %v338_v14 }
 0x277   :  { %v350_v16 = vpop.permute.xlu1 %349 }
 0x278   :  { %v360_v18 = vsel %vm93_vm7, %v357_v15, %v350_v16  ;;  %v348_v19 = vpop.permute.xlu0 %347 }
 0x279   :  { %364 = vst.msk [vmem:[#allocation8 + $0x10] sm:$0xff] %vm361_vm12, %v360_v18  ;;  %v359_v20 = vsel %vm93_vm7, %v356_v17, %v348_v19 }
 0x27a   :  { %363 = vst.msk [vmem:[#allocation8 + $0x8] sm:$0xff] %vm361_vm12, %v359_v20 }
 0x27b   :  { %641 = shalt.err (!%p638_p0)
}
 0x27c   :  { %s642_s30 = scalar_lea.hbm %s788_s3, 384 }
 0x27d   :  { %p643_p1 = scmp.ne.s32.totalorder %s788_s3, %s642_s30  ;;  %p646_p2 = scmp.lt.u32.totalorder %s642_s30, %s788_s3 }
 0x27f   :  { %p648_p3 = pnand %p646_p2, %p643_p1 }
 0x281   :  { %651 = shalt.err (!%p648_p3)
}
 0x282   :  { %376 = dma.vmem_to_hbm [thread:$0]  %s371_s26, 384, %s788_s3, [#allocation4], %s660_s24, %s660_s24, %s661_s25  }
 0x283   :  { %656 = dma.done.wait [#allocation4], 384  }
 0x284   :  { %657 = vsyncadd [#allocation4], 4294966912 }
 0x285   :  { %380 = vsyncpa [#allocation3], 1 }
 0x286   :  { %381 = vsyncpa [#allocation6], 1 }
 0x287   :  { %382 = vsyncpa [#allocation4], 1 }

</bundles_post_ra>
